<compile_context>
chip_gen: v5e
topology: v5e:2x2
jax: 0.10.0
libtpu: 0.0.40
codegen_flags: <defaults>
</compile_context>

<pallas_src>
import functools

import jax
import jax.numpy as jnp
from jax.experimental import pallas as pl
from jax.experimental.pallas import tpu as pltpu


HIDDEN = 256
LANE = 128
SUBLANE = 8
MAX_TILE_B = 512   # batch tile; modest so it fits comfortably in v7x's smaller VMEM


def _round_up(x, m):
    return (x + m - 1) // m * m


def _mlp_kernel(x_ref,
                w1_ref, b1_ref,
                w2_ref, b2_ref,
                w3_ref, b3_ref,
                w4_ref, b4_ref,
                w5_ref, b5_ref,
                o_ref):
    """Fused forward: (Linear -> ReLU) x4 -> Linear.

    Dots run on the MXU with bf16 inputs and f32 accumulation; the bias-add and
    ReLU happen in f32, then activations are cast back to bf16 for the next dot.
    """
    h = x_ref[...]  # bf16 (tile_b, state_dim)

    h = jnp.dot(h, w1_ref[...], preferred_element_type=jnp.float32) + b1_ref[...]
    h = jnp.maximum(h, 0.0).astype(jnp.bfloat16)

    h = jnp.dot(h, w2_ref[...], preferred_element_type=jnp.float32) + b2_ref[...]
    h = jnp.maximum(h, 0.0).astype(jnp.bfloat16)

    h = jnp.dot(h, w3_ref[...], preferred_element_type=jnp.float32) + b3_ref[...]
    h = jnp.maximum(h, 0.0).astype(jnp.bfloat16)

    h = jnp.dot(h, w4_ref[...], preferred_element_type=jnp.float32) + b4_ref[...]
    h = jnp.maximum(h, 0.0).astype(jnp.bfloat16)

    out = jnp.dot(h, w5_ref[...], preferred_element_type=jnp.float32) + b5_ref[...]
    o_ref[...] = out.astype(o_ref.dtype)


def prepare_params(params, n_actions):
    """One-time parameter packing (do NOT call per-forward):
    - cast all weights to bf16 (dots accumulate in f32 inside the kernel),
    - keep biases in f32,
    - pad the final layer's output features up to a multiple of 128 lanes."""
    a_pad = _round_up(max(n_actions, LANE), LANE)
    prepped = {}
    for i in range(1, 5):
        prepped[f"w{i}"] = params[f"w{i}"].astype(jnp.bfloat16)
        prepped[f"b{i}"] = params[f"b{i}"].astype(jnp.float32)
    w5 = params["w5"].astype(jnp.bfloat16)
    b5 = params["b5"].astype(jnp.float32)
    prepped["w5"] = jnp.zeros((HIDDEN, a_pad), jnp.bfloat16).at[:, :n_actions].set(w5)
    prepped["b5"] = jnp.zeros((1, a_pad), jnp.float32).at[:, :n_actions].set(b5)
    return prepped


@functools.partial(jax.jit, static_argnames=("n_actions",))
def breakout_mlp_forward(x, prepped, n_actions):
    """x: (B, ...) any trailing shape; prepped: output of prepare_params."""
    B = x.shape[0]
    x2d = x.reshape(B, -1).astype(jnp.bfloat16)
    state_dim = x2d.shape[1]
    a_pad = prepped["w5"].shape[1]

    # Batch tiling: whole (sublane-aligned) batch if small, else MAX_TILE_B tiles.
    if B <= MAX_TILE_B:
        tile_b = _round_up(max(B, SUBLANE), SUBLANE)
        b_pad = tile_b
    else:
        tile_b = MAX_TILE_B
        b_pad = _round_up(B, MAX_TILE_B)
    if b_pad != B:
        # Pad only the remainder rows instead of rewriting the whole input.
        x2d = jnp.pad(x2d, ((0, b_pad - B), (0, 0)))

    grid = (b_pad // tile_b,)

    def pinned(shape):
        # Same block every grid step -> weights/biases stay resident in VMEM.
        return pl.BlockSpec(shape, lambda i: (0, 0))

    in_specs = [pl.BlockSpec((tile_b, state_dim), lambda i: (i, 0))]
    for i in range(1, 6):
        in_specs.append(pinned(prepped[f"w{i}"].shape))
        in_specs.append(pinned(prepped[f"b{i}"].shape))

    out_pad = pl.pallas_call(
        _mlp_kernel,
        out_shape=jax.ShapeDtypeStruct((b_pad, a_pad), jnp.float32),
        grid=grid,
        in_specs=in_specs,
        out_specs=pl.BlockSpec((tile_b, a_pad), lambda i: (i, 0)),
        compiler_params=pltpu.CompilerParams(
            dimension_semantics=("parallel",),   # shards batch tiles across TCs on v7x
        ),
    )(
        x2d,
        prepped["w1"], prepped["b1"],
        prepped["w2"], prepped["b2"],
        prepped["w3"], prepped["b3"],
        prepped["w4"], prepped["b4"],
        prepped["w5"], prepped["b5"],
    )

    return out_pad[:B, :n_actions]


def init_params(key, state_dim, n_actions):
    """Deterministic init mimicking PyTorch nn.Linear default (U[-1/sqrt(fan_in), ...]).

    Stored as (in_features, out_features) float32; cast/pad via prepare_params."""
    dims = [state_dim, HIDDEN, HIDDEN, HIDDEN, HIDDEN, n_actions]
    params = {}
    for i in range(5):
        fan_in, fan_out = dims[i], dims[i + 1]
        key, kw, kb = jax.random.split(key, 3)
        bound = 1.0 / jnp.sqrt(jnp.float32(fan_in))
        params[f"w{i+1}"] = jax.random.uniform(
            kw, (fan_in, fan_out), jnp.float32, -bound, bound)
        params[f"b{i+1}"] = jax.random.uniform(
            kb, (1, fan_out), jnp.float32, -bound, bound)
    return params


if __name__ == "__main__":
    key = jax.random.PRNGKey(0)
    k_x, k_p = jax.random.split(key)

    # Small, forward-consistent shapes: batch=2, input (4, 4, 8) -> state_dim=128.
    batch, c, h, w = 2, 4, 4, 8
    state_dim = c * h * w
    n_actions = 4

    x = jax.random.normal(k_x, (batch, c, h, w), jnp.float32)
    params = init_params(k_p, state_dim, n_actions)
    prepped = prepare_params(params, n_actions)       # one-time packing

    out = breakout_mlp_forward(x, prepped, n_actions)
    jax.block_until_ready(out)

    # Pure-JAX f32 reference of the fused (bf16-weight) kernel.
    xf = x.reshape(batch, -1)
    ref = xf
    for i in range(1, 5):
        ref = jnp.maximum(ref @ params[f"w{i}"] + params[f"b{i}"], 0.0)
    ref = ref @ params["w5"] + params["b5"]

    assert out.shape == (batch, n_actions)
    # bf16 weights/activations (f32 accumulation) -> loosened tolerance vs. f32 ref.
    assert jnp.allclose(out, ref, atol=5e-2, rtol=5e-2)

    print("KERNEL_OK")
</pallas_src>

<mosaic_0001>
module attributes {stable_mosaic.version = 11 : i64} {
  func.func @_mlp_kernel(%arg0: i32, %arg1: memref<8x128xbf16, #tpu.memory_space<vmem>>, %arg2: memref<128x256xbf16, #tpu.memory_space<vmem>>, %arg3: memref<1x256xf32, #tpu.memory_space<vmem>>, %arg4: memref<256x256xbf16, #tpu.memory_space<vmem>>, %arg5: memref<1x256xf32, #tpu.memory_space<vmem>>, %arg6: memref<256x256xbf16, #tpu.memory_space<vmem>>, %arg7: memref<1x256xf32, #tpu.memory_space<vmem>>, %arg8: memref<256x256xbf16, #tpu.memory_space<vmem>>, %arg9: memref<1x256xf32, #tpu.memory_space<vmem>>, %arg10: memref<256x128xbf16, #tpu.memory_space<vmem>>, %arg11: memref<1x128xf32, #tpu.memory_space<vmem>>, %arg12: memref<8x128xf32, #tpu.memory_space<vmem>>) attributes {dimension_semantics = [#tpu.dimension_semantics<parallel>], iteration_bounds = array<i64: 1>, scalar_prefetch = 0 : i64, scratch_operands = 0 : i64, tpu.core_type = #tpu.core_type<tc>, window_params = [{transform_indices = @transform_0, window_bounds = array<i64: 8, 128>}, {pipeline_mode = #tpu.pipeline_mode<synchronous>, transform_indices = @transform_1, window_bounds = array<i64: 128, 256>}, {pipeline_mode = #tpu.pipeline_mode<synchronous>, transform_indices = @transform_2, window_bounds = array<i64: 1, 256>}, {pipeline_mode = #tpu.pipeline_mode<synchronous>, transform_indices = @transform_3, window_bounds = array<i64: 256, 256>}, {pipeline_mode = #tpu.pipeline_mode<synchronous>, transform_indices = @transform_4, window_bounds = array<i64: 1, 256>}, {pipeline_mode = #tpu.pipeline_mode<synchronous>, transform_indices = @transform_5, window_bounds = array<i64: 256, 256>}, {pipeline_mode = #tpu.pipeline_mode<synchronous>, transform_indices = @transform_6, window_bounds = array<i64: 1, 256>}, {pipeline_mode = #tpu.pipeline_mode<synchronous>, transform_indices = @transform_7, window_bounds = array<i64: 256, 256>}, {pipeline_mode = #tpu.pipeline_mode<synchronous>, transform_indices = @transform_8, window_bounds = array<i64: 1, 256>}, {pipeline_mode = #tpu.pipeline_mode<synchronous>, transform_indices = @transform_9, window_bounds = array<i64: 256, 128>}, {pipeline_mode = #tpu.pipeline_mode<synchronous>, transform_indices = @transform_10, window_bounds = array<i64: 1, 128>}, {transform_indices = @transform_11, window_bounds = array<i64: 8, 128>}]} {
    %c0 = arith.constant 0 : index
    %c0_0 = arith.constant 0 : index
    %0 = vector.load %arg1[%c0, %c0_0] : memref<8x128xbf16, #tpu.memory_space<vmem>>, vector<8x128xbf16>
    %c0_1 = arith.constant 0 : index
    %c0_2 = arith.constant 0 : index
    %1 = vector.load %arg2[%c0_1, %c0_2] : memref<128x256xbf16, #tpu.memory_space<vmem>>, vector<128x256xbf16>
    %cst = arith.constant dense<0.000000e+00> : vector<8x256xf32>
    %2 = tpu.matmul %0, %1, %cst {dimension_numbers = #tpu.dot_dimension_numbers<[1], [0], [0], [1], [0, 0, 1, 1], [], []>} : vector<8x128xbf16>, vector<128x256xbf16>, vector<8x256xf32> -> vector<8x256xf32>
    %c0_3 = arith.constant 0 : index
    %c0_4 = arith.constant 0 : index
    %3 = vector.load %arg3[%c0_3, %c0_4] : memref<1x256xf32, #tpu.memory_space<vmem>>, vector<1x256xf32>
    %4 = vector.broadcast %3 : vector<1x256xf32> to vector<8x256xf32>
    %5 = arith.addf %2, %4 : vector<8x256xf32>
    %cst_5 = arith.constant 0.000000e+00 : f32
    %6 = vector.broadcast %cst_5 : f32 to vector<8x256xf32>
    %7 = arith.maximumf %5, %6 : vector<8x256xf32>
    %8 = arith.truncf %7 : vector<8x256xf32> to vector<8x256xbf16>
    %c0_6 = arith.constant 0 : index
    %c0_7 = arith.constant 0 : index
    %9 = vector.load %arg4[%c0_6, %c0_7] : memref<256x256xbf16, #tpu.memory_space<vmem>>, vector<256x256xbf16>
    %cst_8 = arith.constant dense<0.000000e+00> : vector<8x256xf32>
    %10 = tpu.matmul %8, %9, %cst_8 {dimension_numbers = #tpu.dot_dimension_numbers<[1], [0], [0], [1], [0, 0, 1, 1], [], []>} : vector<8x256xbf16>, vector<256x256xbf16>, vector<8x256xf32> -> vector<8x256xf32>
    %c0_9 = arith.constant 0 : index
    %c0_10 = arith.constant 0 : index
    %11 = vector.load %arg5[%c0_9, %c0_10] : memref<1x256xf32, #tpu.memory_space<vmem>>, vector<1x256xf32>
    %12 = vector.broadcast %11 : vector<1x256xf32> to vector<8x256xf32>
    %13 = arith.addf %10, %12 : vector<8x256xf32>
    %cst_11 = arith.constant 0.000000e+00 : f32
    %14 = vector.broadcast %cst_11 : f32 to vector<8x256xf32>
    %15 = arith.maximumf %13, %14 : vector<8x256xf32>
    %16 = arith.truncf %15 : vector<8x256xf32> to vector<8x256xbf16>
    %c0_12 = arith.constant 0 : index
    %c0_13 = arith.constant 0 : index
    %17 = vector.load %arg6[%c0_12, %c0_13] : memref<256x256xbf16, #tpu.memory_space<vmem>>, vector<256x256xbf16>
    %cst_14 = arith.constant dense<0.000000e+00> : vector<8x256xf32>
    %18 = tpu.matmul %16, %17, %cst_14 {dimension_numbers = #tpu.dot_dimension_numbers<[1], [0], [0], [1], [0, 0, 1, 1], [], []>} : vector<8x256xbf16>, vector<256x256xbf16>, vector<8x256xf32> -> vector<8x256xf32>
    %c0_15 = arith.constant 0 : index
    %c0_16 = arith.constant 0 : index
    %19 = vector.load %arg7[%c0_15, %c0_16] : memref<1x256xf32, #tpu.memory_space<vmem>>, vector<1x256xf32>
    %20 = vector.broadcast %19 : vector<1x256xf32> to vector<8x256xf32>
    %21 = arith.addf %18, %20 : vector<8x256xf32>
    %cst_17 = arith.constant 0.000000e+00 : f32
    %22 = vector.broadcast %cst_17 : f32 to vector<8x256xf32>
    %23 = arith.maximumf %21, %22 : vector<8x256xf32>
    %24 = arith.truncf %23 : vector<8x256xf32> to vector<8x256xbf16>
    %c0_18 = arith.constant 0 : index
    %c0_19 = arith.constant 0 : index
    %25 = vector.load %arg8[%c0_18, %c0_19] : memref<256x256xbf16, #tpu.memory_space<vmem>>, vector<256x256xbf16>
    %cst_20 = arith.constant dense<0.000000e+00> : vector<8x256xf32>
    %26 = tpu.matmul %24, %25, %cst_20 {dimension_numbers = #tpu.dot_dimension_numbers<[1], [0], [0], [1], [0, 0, 1, 1], [], []>} : vector<8x256xbf16>, vector<256x256xbf16>, vector<8x256xf32> -> vector<8x256xf32>
    %c0_21 = arith.constant 0 : index
    %c0_22 = arith.constant 0 : index
    %27 = vector.load %arg9[%c0_21, %c0_22] : memref<1x256xf32, #tpu.memory_space<vmem>>, vector<1x256xf32>
    %28 = vector.broadcast %27 : vector<1x256xf32> to vector<8x256xf32>
    %29 = arith.addf %26, %28 : vector<8x256xf32>
    %cst_23 = arith.constant 0.000000e+00 : f32
    %30 = vector.broadcast %cst_23 : f32 to vector<8x256xf32>
    %31 = arith.maximumf %29, %30 : vector<8x256xf32>
    %32 = arith.truncf %31 : vector<8x256xf32> to vector<8x256xbf16>
    %c0_24 = arith.constant 0 : index
    %c0_25 = arith.constant 0 : index
    %33 = vector.load %arg10[%c0_24, %c0_25] : memref<256x128xbf16, #tpu.memory_space<vmem>>, vector<256x128xbf16>
    %cst_26 = arith.constant dense<0.000000e+00> : vector<8x128xf32>
    %34 = tpu.matmul %32, %33, %cst_26 {dimension_numbers = #tpu.dot_dimension_numbers<[1], [0], [0], [1], [0, 0, 1, 1], [], []>} : vector<8x256xbf16>, vector<256x128xbf16>, vector<8x128xf32> -> vector<8x128xf32>
    %c0_27 = arith.constant 0 : index
    %c0_28 = arith.constant 0 : index
    %35 = vector.load %arg11[%c0_27, %c0_28] : memref<1x128xf32, #tpu.memory_space<vmem>>, vector<1x128xf32>
    %36 = vector.broadcast %35 : vector<1x128xf32> to vector<8x128xf32>
    %37 = arith.addf %34, %36 : vector<8x128xf32>
    %c0_29 = arith.constant 0 : index
    %c0_30 = arith.constant 0 : index
    %38 = vector.load %arg12[%c0_29, %c0_30] : memref<8x128xf32, #tpu.memory_space<vmem>>, vector<8x128xf32>
    tpu.vector_store %arg12[%c0_29, %c0_30], %37 {strides = array<i32>} : memref<8x128xf32, #tpu.memory_space<vmem>>, vector<8x128xf32>,
    return
  }
  func.func @transform_0(%arg0: i32) -> (i32, i32) {
    %c0_i32 = arith.constant 0 : i32
    %c0_i32_0 = arith.constant 0 : i32
    return %arg0, %c0_i32 : i32, i32
  }
  func.func @transform_1(%arg0: i32) -> (i32, i32) {
    %c0_i32 = arith.constant 0 : i32
    %c0_i32_0 = arith.constant 0 : i32
    %c0_i32_1 = arith.constant 0 : i32
    return %c0_i32, %c0_i32_0 : i32, i32
  }
  func.func @transform_2(%arg0: i32) -> (i32, i32) {
    %c0_i32 = arith.constant 0 : i32
    %c0_i32_0 = arith.constant 0 : i32
    %c0_i32_1 = arith.constant 0 : i32
    return %c0_i32, %c0_i32_0 : i32, i32
  }
  func.func @transform_3(%arg0: i32) -> (i32, i32) {
    %c0_i32 = arith.constant 0 : i32
    %c0_i32_0 = arith.constant 0 : i32
    %c0_i32_1 = arith.constant 0 : i32
    return %c0_i32, %c0_i32_0 : i32, i32
  }
  func.func @transform_4(%arg0: i32) -> (i32, i32) {
    %c0_i32 = arith.constant 0 : i32
    %c0_i32_0 = arith.constant 0 : i32
    %c0_i32_1 = arith.constant 0 : i32
    return %c0_i32, %c0_i32_0 : i32, i32
  }
  func.func @transform_5(%arg0: i32) -> (i32, i32) {
    %c0_i32 = arith.constant 0 : i32
    %c0_i32_0 = arith.constant 0 : i32
    %c0_i32_1 = arith.constant 0 : i32
    return %c0_i32, %c0_i32_0 : i32, i32
  }
  func.func @transform_6(%arg0: i32) -> (i32, i32) {
    %c0_i32 = arith.constant 0 : i32
    %c0_i32_0 = arith.constant 0 : i32
    %c0_i32_1 = arith.constant 0 : i32
    return %c0_i32, %c0_i32_0 : i32, i32
  }
  func.func @transform_7(%arg0: i32) -> (i32, i32) {
    %c0_i32 = arith.constant 0 : i32
    %c0_i32_0 = arith.constant 0 : i32
    %c0_i32_1 = arith.constant 0 : i32
    return %c0_i32, %c0_i32_0 : i32, i32
  }
  func.func @transform_8(%arg0: i32) -> (i32, i32) {
    %c0_i32 = arith.constant 0 : i32
    %c0_i32_0 = arith.constant 0 : i32
    %c0_i32_1 = arith.constant 0 : i32
    return %c0_i32, %c0_i32_0 : i32, i32
  }
  func.func @transform_9(%arg0: i32) -> (i32, i32) {
    %c0_i32 = arith.constant 0 : i32
    %c0_i32_0 = arith.constant 0 : i32
    %c0_i32_1 = arith.constant 0 : i32
    return %c0_i32, %c0_i32_0 : i32, i32
  }
  func.func @transform_10(%arg0: i32) -> (i32, i32) {
    %c0_i32 = arith.constant 0 : i32
    %c0_i32_0 = arith.constant 0 : i32
    %c0_i32_1 = arith.constant 0 : i32
    return %c0_i32, %c0_i32_0 : i32, i32
  }
  func.func @transform_11(%arg0: i32) -> (i32, i32) {
    %c0_i32 = arith.constant 0 : i32
    %c0_i32_0 = arith.constant 0 : i32
    return %arg0, %c0_i32 : i32, i32
  }
}

</mosaic_0001>

<bundles_post_ra>
// kernel: breakout_mlp_forward.1
= control target key start
LH: loop header
LB: loop body
LE: loop exit
PB: predicated region body
PF: predicated region fallthrough
CT: control target
= control target key end

     0   :  { %16 = vsyncpa [#allocation3], 0  ;;  %s2058_s0 = inlined_call_operand.vmem [shape: bf16[8,128], index: 0, kind: input, shape index: {}]   ;;  %s2059_s1 = inlined_call_operand.hbm [shape: bf16[128,256], index: 1, kind: input, shape index: {}]   ;;  %s2060_s2 = inlined_call_operand.vmem [shape: f32[1,256], index: 2, kind: input, shape index: {}]   ;;  %s2061_s3 = inlined_call_operand.hbm [shape: bf16[256,256], index: 3, kind: input, shape index: {}]   ;;  %s2062_s4 = inlined_call_operand.vmem [shape: f32[1,256], index: 4, kind: input, shape index: {}]   ;;  %s2063_s5 = inlined_call_operand.hbm [shape: bf16[256,256], index: 5, kind: input, shape index: {}]   ;;  %s2064_s6 = inlined_call_operand.vmem [shape: f32[1,256], index: 6, kind: input, shape index: {}]   ;;  %s2065_s7 = inlined_call_operand.hbm [shape: bf16[256,256], index: 7, kind: input, shape index: {}]   ;;  %s2066_s8 = inlined_call_operand.vmem [shape: f32[1,256], index: 8, kind: input, shape index: {}]   ;;  %s2067_s9 = inlined_call_operand.hbm [shape: bf16[256,128], index: 9, kind: input, shape index: {}]   ;;  %s2068_s10 = inlined_call_operand.vmem [shape: f32[1,128], index: 10, kind: input, shape index: {}]   ;;  %s2069_s11 = inlined_call_operand.vmem [shape: f32[8,128], index: 11, kind: output, shape index: {}]  }
   0x1   :  { %17 = vsyncpa [#allocation5], 0 }
   0x2   :  { %18 = vsyncpa [#allocation8], 0  ;;  %s40_s19 = sshll.u32 %s2061_s3, 4  ;;  %s1953_s20 = smov [#allocation4]   ;;  %s41_s19 = int_to_ptr.hbm [resolvable:$true] %s40_s19 }
   0x3   :  { %s42_s21 = sshll.u32 %s1953_s20, 4  ;;  %s70_s24 = sshll.u32 %s2065_s7, 4  ;;  %s43_s21 = int_to_ptr.vmem [resolvable:$true] %s42_s21  ;;  %s71_s24 = int_to_ptr.hbm [resolvable:$true] %s70_s24 }
   0x4   :  { %s1954_s25 = smov 128   ;;  %s1955_s26 = smov 8  }
   0x5   :  { %48 = dma.hbm_to_vmem [thread:$0]  %s41_s19, 4096, %s43_s21, [#allocation5], %s1954_s25, %s1954_s25, %s1955_s26  }
   0x6   :  { %s1956_s27 = smov [#allocation7]   ;;  %s25_s12 = sshll.u32 %s2059_s1, 4  ;;  %s26_s12 = int_to_ptr.hbm [resolvable:$true] %s25_s12 }
   0x7   :  { %s72_s28 = sshll.u32 %s1956_s27, 4  ;;  %s55_s14 = sshll.u32 %s2063_s5, 4  ;;  %s73_s28 = int_to_ptr.vmem [resolvable:$true] %s72_s28  ;;  %s56_s14 = int_to_ptr.hbm [resolvable:$true] %s55_s14 }
   0x8   :  { %78 = dma.hbm_to_vmem [thread:$0]  %s71_s24, 4096, %s73_s28, [#allocation8], %s1954_s25, %s1954_s25, %s1955_s26  }
   0x9   :  { %s1957_s15 = smov [#allocation2]   ;;  %s1958_s7 = smov [#allocation6]  }
   0xa   :  { %s27_s16 = sshll.u32 %s1957_s15, 4  ;;  %s57_s17 = sshll.u32 %s1958_s7, 4  ;;  %s28_s16 = int_to_ptr.vmem [resolvable:$true] %s27_s16  ;;  %s58_s17 = int_to_ptr.vmem [resolvable:$true] %s57_s17 }
   0xb   :  { %33 = dma.hbm_to_vmem [thread:$0]  %s26_s12, 2048, %s28_s16, [#allocation3], %s1954_s25, %s1954_s25, %s1955_s26  }
   0xc   :  { %s85_s20 = sshll.u32 %s2067_s9, 4  ;;  %s1959_s1 = smov [#allocation9]   ;;  %s86_s20 = int_to_ptr.hbm [resolvable:$true] %s85_s20 }
   0xd   :  { %63 = dma.hbm_to_vmem [thread:$0]  %s56_s14, 4096, %s58_s17, [#allocation5], %s1954_s25, %s1954_s25, %s1955_s26  }
   0xe   :  { %s87_s21 = sshll.u32 %s1959_s1, 4  ;;  %s1960_s22 = smov 64   ;;  %s88_s21 = int_to_ptr.vmem [resolvable:$true] %s87_s21 }
   0xf   :  { %s1961_s23 = smov 4  }
  0x10   :  { %93 = dma.hbm_to_vmem [thread:$0]  %s86_s20, 2048, %s88_s21, [#allocation8], %s1960_s22, %s1960_s22, %s1961_s23  }
  0x11   :  { %1947 = dma.done.wait [#allocation3], 2048  }
  0x12   :  { %1948 = vsyncadd [#allocation3], 4294965248 }
  0x13   :  { %1949 = dma.done.wait [#allocation5], 8192  }
  0x14   :  { %1950 = vsyncadd [#allocation5], 4294959104 }
  0x15   :  { %1951 = dma.done.wait [#allocation8], 6144  }
  0x16   :  { %1952 = vsyncadd [#allocation8], 4294961152  ;;  %v1235_v0 = vld [vmem:[#allocation2 + $0x70] sm:$0xf]  ;;  %v1704_v1 = vld [vmem:[#allocation2 + $0x74] sm:$0xf0] }
  0x17   :  { %v1703_v2 = vld [vmem:[#allocation2 + $0x74] sm:$0xf]  ;;  %v1236_v3 = vor.u32 %v1704_v1, %v1235_v0  ;;  %v1237_v4 = vld [vmem:[#allocation2 + $0x78] sm:$0xf0]  ;;  %v1227_v5 = vld [vmem:[#allocation2 + $0x60] sm:$0xf] }
  0x18   :  { %v1702_v6 = vld [vmem:[#allocation2 + $0x64] sm:$0xf0]  ;;  %v1240_v7 = vor.u32 %v1703_v2, %v1237_v4  ;;  %v1701_v8 = vld [vmem:[#allocation2 + $0x64] sm:$0xf]  ;;  %v1229_v9 = vld [vmem:[#allocation2 + $0x68] sm:$0xf0] }
  0x19   :  { %219 = vmatpush.bf16.msra.mxu0 %v1236_v3  ;;  %v1228_v10 = vor.u32 %v1702_v6, %v1227_v5  ;;  %v1232_v11 = vor.u32 %v1701_v8, %v1229_v9  ;;  %v1219_v12 = vld [vmem:[#allocation2 + $0x50] sm:$0xf]  ;;  %v1700_v13 = vld [vmem:[#allocation2 + $0x54] sm:$0xf0]  ;;  %v1699_v14 = vld [vmem:[#allocation2 + $0x54] sm:$0xf] }
  0x1a   :  { %232 = vmatpush.bf16.msra.mxu1 %v1240_v7  ;;  %v1221_v15 = vld [vmem:[#allocation2 + $0x58] sm:$0xf0]  ;;  %v1220_v16 = vor.u32 %v1700_v13, %v1219_v12  ;;  %v1211_v18 = vld [vmem:[#allocation2 + $0x40] sm:$0xf]  ;;  %v1698_v19 = vld [vmem:[#allocation2 + $0x44] sm:$0xf0] }
  0x1b   :  { %v1224_v17 = vor.u32 %v1699_v14, %v1221_v15  ;;  %v1697_v20 = vld [vmem:[#allocation2 + $0x44] sm:$0xf]  ;;  %v1213_v21 = vld [vmem:[#allocation2 + $0x48] sm:$0xf0]  ;;  %v1212_v22 = vor.u32 %v1698_v19, %v1211_v18  ;;  %v1299_v23 = vld [vmem:[#allocation4 + $0x70] sm:$0xf] }
  0x1c   :  { %v1720_v24 = vld [vmem:[#allocation4 + $0x74] sm:$0xf0]  ;;  %v1363_v25 = vld [vmem:[#allocation4 + $0xf0] sm:$0xf]  ;;  %v1216_v26 = vor.u32 %v1697_v20, %v1213_v21  ;;  %v1695_v31 = vld [vmem:[#allocation2 + $0x34] sm:$0xf] }
  0x1d   :  { %220 = vmatpush.bf16.msra.mxu0 %v1228_v10  ;;  %v1203_v27 = vld [vmem:[#allocation2 + $0x30] sm:$0xf]  ;;  %v1696_v28 = vld [vmem:[#allocation2 + $0x34] sm:$0xf0]  ;;  %v1300_v29 = vor.u32 %v1720_v24, %v1299_v23  ;;  %v1205_v32 = vld [vmem:[#allocation2 + $0x38] sm:$0xf0] }
  0x1e   :  { %233 = vmatpush.bf16.msra.mxu1 %v1232_v11  ;;  %v1736_v30 = vld [vmem:[#allocation4 + $0xf4] sm:$0xf0]  ;;  %v1291_v34 = vld [vmem:[#allocation4 + $0x60] sm:$0xf]  ;;  %v1718_v35 = vld [vmem:[#allocation4 + $0x64] sm:$0xf0]  ;;  %v1204_v38 = vor.u32 %v1696_v28, %v1203_v27  ;;  %v1208_v43 = vor.u32 %v1695_v31, %v1205_v32 }
  0x1f   :  { %v1364_v33 = vor.u32 %v1736_v30, %v1363_v25  ;;  %447 = vmatpush.bf16.msra.mxu2 %v1300_v29  ;;  %v1355_v36 = vld [vmem:[#allocation4 + $0xe0] sm:$0xf]  ;;  %v1734_v37 = vld [vmem:[#allocation4 + $0xe4] sm:$0xf0]  ;;  %v1292_v41 = vor.u32 %v1718_v35, %v1291_v34  ;;  %v1693_v44 = vld [vmem:[#allocation2 + $0x24] sm:$0xf] }
  0x20   :  { %v1195_v39 = vld [vmem:[#allocation2 + $0x20] sm:$0xf]  ;;  %v1694_v40 = vld [vmem:[#allocation2 + $0x24] sm:$0xf0]  ;;  %v1356_v42 = vor.u32 %v1734_v37, %v1355_v36  ;;  %v1283_v45 = vld [vmem:[#allocation4 + $0x50] sm:$0xf] }
  0x21   :  { %221 = vmatpush.bf16.msra.mxu0 %v1220_v16  ;;  %460 = vmatpush.bf16.msra.mxu3 %v1364_v33  ;;  %v1716_v46 = vld [vmem:[#allocation4 + $0x54] sm:$0xf0]  ;;  %v1197_v47 = vld [vmem:[#allocation2 + $0x28] sm:$0xf0]  ;;  %v1347_v48 = vld [vmem:[#allocation4 + $0xd0] sm:$0xf]  ;;  %v1196_v51 = vor.u32 %v1694_v40, %v1195_v39 }
  0x22   :  { %234 = vmatpush.bf16.msra.mxu1 %v1224_v17  ;;  %v1732_v49 = vld [vmem:[#allocation4 + $0xd4] sm:$0xf0]  ;;  %v1284_v50 = vor.u32 %v1716_v46, %v1283_v45  ;;  %v1187_v52 = vld [vmem:[#allocation2 + $0x10] sm:$0xf]  ;;  %v1275_v54 = vld [vmem:[#allocation4 + $0x40] sm:$0xf]  ;;  %v1200_v56 = vor.u32 %v1693_v44, %v1197_v47 }
  0x23   :  { %448 = vmatpush.bf16.msra.mxu2 %v1292_v41  ;;  %v1348_v53 = vor.u32 %v1732_v49, %v1347_v48  ;;  %v1714_v55 = vld [vmem:[#allocation4 + $0x44] sm:$0xf0]  ;;  %v1692_v57 = vld [vmem:[#allocation2 + $0x14] sm:$0xf0]  ;;  %v1339_v58 = vld [vmem:[#allocation4 + $0xc0] sm:$0xf] }
  0x24   :  { %v1730_v59 = vld [vmem:[#allocation4 + $0xc4] sm:$0xf0]  ;;  %v1691_v60 = vld [vmem:[#allocation2 + $0x14] sm:$0xf]  ;;  %v1189_v61 = vld [vmem:[#allocation2 + $0x18] sm:$0xf0]  ;;  %v1276_v63 = vor.u32 %v1714_v55, %v1275_v54  ;;  %v1188_v0 = vor.u32 %v1692_v57, %v1187_v52 }
  0x25   :  { %222 = vmatpush.bf16.msra.mxu0 %v1212_v22  ;;  %461 = vmatpush.bf16.msra.mxu3 %v1356_v42  ;;  %v1179_v62 = vld [vmem:[#allocation2] sm:$0xf]  ;;  %v1690_v1 = vld [vmem:[#allocation2 + $0x4] sm:$0xf0]  ;;  %v1340_v2 = vor.u32 %v1730_v59, %v1339_v58  ;;  %v1267_v3 = vld [vmem:[#allocation4 + $0x30] sm:$0xf]  ;;  %v1192_v5 = vor.u32 %v1691_v60, %v1189_v61 }
  0x26   :  { %235 = vmatpush.bf16.msra.mxu1 %v1216_v26  ;;  %v1712_v4 = vld [vmem:[#allocation4 + $0x34] sm:$0xf0]  ;;  %v1689_v6 = vld [vmem:[#allocation2 + $0x4] sm:$0xf]  ;;  %v1331_v7 = vld [vmem:[#allocation4 + $0xb0] sm:$0xf]  ;;  %v1180_v15 = vor.u32 %v1690_v1, %v1179_v62 }
  0x27   :  { %449 = vmatpush.bf16.msra.mxu2 %v1284_v50  ;;  %v1728_v8 = vld [vmem:[#allocation4 + $0xb4] sm:$0xf0]  ;;  %v1181_v9 = vld [vmem:[#allocation2 + $0x8] sm:$0xf0]  ;;  %v1719_v10 = vld [vmem:[#allocation4 + $0x74] sm:$0xf]  ;;  %v1268_v14 = vor.u32 %v1712_v4, %v1267_v3 }
  0x28   :  { %v1301_v11 = vld [vmem:[#allocation4 + $0x78] sm:$0xf0]  ;;  %v1735_v12 = vld [vmem:[#allocation4 + $0xf4] sm:$0xf]  ;;  %v1332_v16 = vor.u32 %v1728_v8, %v1331_v7  ;;  %v1259_v17 = vld [vmem:[#allocation4 + $0x20] sm:$0xf]  ;;  %v1184_v19 = vor.u32 %v1689_v6, %v1181_v9 }
  0x29   :  { %223 = vmatpush.bf16.msra.mxu0 %v1204_v38  ;;  %462 = vmatpush.bf16.msra.mxu3 %v1348_v53  ;;  %v1365_v13 = vld [vmem:[#allocation4 + $0xf8] sm:$0xf0]  ;;  %v1710_v18 = vld [vmem:[#allocation4 + $0x24] sm:$0xf0]  ;;  %v1304_v20 = vor.u32 %v1719_v10, %v1301_v11  ;;  %v1323_v21 = vld [vmem:[#allocation4 + $0xa0] sm:$0xf] }
  0x2a   :  { %236 = vmatpush.bf16.msra.mxu1 %v1208_v43  ;;  %v1726_v22 = vld [vmem:[#allocation4 + $0xa4] sm:$0xf0]  ;;  %v1368_v23 = vor.u32 %v1735_v12, %v1365_v13  ;;  %v1717_v24 = vld [vmem:[#allocation4 + $0x64] sm:$0xf]  ;;  %v1293_v25 = vld [vmem:[#allocation4 + $0x68] sm:$0xf0]  ;;  %v1260_v28 = vor.u32 %v1710_v18, %v1259_v17 }
  0x2b   :  { %450 = vmatpush.bf16.msra.mxu2 %v1276_v63  ;;  %v1733_v26 = vld [vmem:[#allocation4 + $0xe4] sm:$0xf]  ;;  %v1357_v27 = vld [vmem:[#allocation4 + $0xe8] sm:$0xf0]  ;;  %v116_v29 = vld [vmem:[%s2058_s0] sm:$0xf]  ;;  %v1324_v30 = vor.u32 %v1726_v22, %v1323_v21  ;;  %v1296_v31 = vor.u32 %v1717_v24, %v1293_v25 }
  0x2c   :  { %v1360_v32 = vor.u32 %v1733_v26, %v1357_v27  ;;  %v1715_v33 = vld [vmem:[#allocation4 + $0x54] sm:$0xf]  ;;  %v1285_v34 = vld [vmem:[#allocation4 + $0x58] sm:$0xf0]  ;;  %v1713_v39 = vld [vmem:[#allocation4 + $0x44] sm:$0xf] }
  0x2d   :  { %224 = vmatpush.bf16.msra.mxu0 %v1196_v51  ;;  %463 = vmatpush.bf16.msra.mxu3 %v1340_v2  ;;  %v1731_v35 = vld [vmem:[#allocation4 + $0xd4] sm:$0xf]  ;;  %v1349_v36 = vld [vmem:[#allocation4 + $0xd8] sm:$0xf0]  ;;  %v1288_v37 = vor.u32 %v1715_v33, %v1285_v34  ;;  %v1277_v40 = vld [vmem:[#allocation4 + $0x48] sm:$0xf0] }
  0x2e   :  { %237 = vmatpush.bf16.msra.mxu1 %v1200_v56  ;;  %v1352_v38 = vor.u32 %v1731_v35, %v1349_v36  ;;  %v1729_v41 = vld [vmem:[#allocation4 + $0xc4] sm:$0xf]  ;;  %v1341_v42 = vld [vmem:[#allocation4 + $0xc8] sm:$0xf0]  ;;  %v1280_v43 = vor.u32 %v1713_v39, %v1277_v40  ;;  %v1711_v45 = vld [vmem:[#allocation4 + $0x34] sm:$0xf] }
  0x2f   :  { %451 = vmatpush.bf16.msra.mxu2 %v1268_v14  ;;  %v1344_v44 = vor.u32 %v1729_v41, %v1341_v42  ;;  %v1269_v46 = vld [vmem:[#allocation4 + $0x38] sm:$0xf0]  ;;  %v1727_v47 = vld [vmem:[#allocation4 + $0xb4] sm:$0xf]  ;;  %v1709_v51 = vld [vmem:[#allocation4 + $0x24] sm:$0xf] }
  0x30   :  { %v1333_v48 = vld [vmem:[#allocation4 + $0xb8] sm:$0xf0]  ;;  %v1272_v49 = vor.u32 %v1711_v45, %v1269_v46  ;;  %v1261_v52 = vld [vmem:[#allocation4 + $0x28] sm:$0xf0]  ;;  %v1725_v53 = vld [vmem:[#allocation4 + $0xa4] sm:$0xf] }
  0x31   :  { %225 = vmatpush.bf16.msra.mxu0 %v1188_v0  ;;  %464 = vmatpush.bf16.msra.mxu3 %v1332_v16  ;;  %v1336_v50 = vor.u32 %v1727_v47, %v1333_v48  ;;  %v1325_v54 = vld [vmem:[#allocation4 + $0xa8] sm:$0xf0]  ;;  %v1264_v55 = vor.u32 %v1709_v51, %v1261_v52  ;;  %v1251_v57 = vld [vmem:[#allocation4 + $0x10] sm:$0xf]  ;;  %v1708_v58 = vld [vmem:[#allocation4 + $0x14] sm:$0xf0] }
  0x32   :  { %238 = vmatpush.bf16.msra.mxu1 %v1192_v5  ;;  %v1328_v56 = vor.u32 %v1725_v53, %v1325_v54  ;;  %v1315_v59 = vld [vmem:[#allocation4 + $0x90] sm:$0xf]  ;;  %v1252_v60 = vor.u32 %v1708_v58, %v1251_v57  ;;  %v1724_v61 = vld [vmem:[#allocation4 + $0x94] sm:$0xf0]  ;;  %v1707_v62 = vld [vmem:[#allocation4 + $0x14] sm:$0xf] }
  0x33   :  { %452 = vmatpush.bf16.msra.mxu2 %v1260_v28  ;;  %v1253_v63 = vld [vmem:[#allocation4 + $0x18] sm:$0xf0]  ;;  %v1316_v0 = vor.u32 %v1724_v61, %v1315_v59  ;;  %v1723_v2 = vld [vmem:[#allocation4 + $0x94] sm:$0xf]  ;;  %v1243_v5 = vld [vmem:[#allocation4] sm:$0xf] }
  0x34   :  { %v1256_v1 = vor.u32 %v1707_v62, %v1253_v63  ;;  %v1317_v3 = vld [vmem:[#allocation4 + $0x98] sm:$0xf0]  ;;  %v1706_v6 = vld [vmem:[#allocation4 + $0x4] sm:$0xf0]  ;;  %v1307_v7 = vld [vmem:[#allocation4 + $0x80] sm:$0xf] }
  0x35   :  { %226 = vmatpush.bf16.msra.mxu0 %v1180_v15  ;;  %465 = vmatpush.bf16.msra.mxu3 %v1324_v30  ;;  %v1320_v4 = vor.u32 %v1723_v2, %v1317_v3  ;;  %v1244_v8 = vor.u32 %v1706_v6, %v1243_v5  ;;  %v1722_v9 = vld [vmem:[#allocation4 + $0x84] sm:$0xf0]  ;;  %v1705_v10 = vld [vmem:[#allocation4 + $0x4] sm:$0xf]  ;;  %v1245_v11 = vld [vmem:[#allocation4 + $0x8] sm:$0xf0] }
  0x36   :  { %239 = vmatpush.bf16.msra.mxu1 %v1184_v19  ;;  %v1308_v12 = vor.u32 %v1722_v9, %v1307_v7  ;;  %v1248_v13 = vor.u32 %v1705_v10, %v1245_v11  ;;  %v1721_v14 = vld [vmem:[#allocation4 + $0x84] sm:$0xf]  ;;  %v1309_v15 = vld [vmem:[#allocation4 + $0x88] sm:$0xf0]  ;;  %v1491_v17 = vld [vmem:[#allocation6 + $0xf0] sm:$0xf] }
  0x37   :  { %453 = vmatpush.bf16.msra.mxu2 %v1252_v60  ;;  %v1312_v16 = vor.u32 %v1721_v14, %v1309_v15  ;;  %v1768_v18 = vld [vmem:[#allocation6 + $0xf4] sm:$0xf0]  ;;  %v1767_v19 = vld [vmem:[#allocation6 + $0xf4] sm:$0xf]  ;;  %v1493_v21 = vld [vmem:[#allocation6 + $0xf8] sm:$0xf0] }
  0x38   :  { %227 = vmatmul.bf16.vlgmr.msra.gmra.mxu0 %v116_v29  ;;  %v1483_v22 = vld [vmem:[#allocation6 + $0xe0] sm:$0xf]  ;;  %v1496_v24 = vor.u32 %v1767_v19, %v1493_v21  ;;  %v1765_v25 = vld [vmem:[#allocation6 + $0xe4] sm:$0xf]  ;;  %v1485_v26 = vld [vmem:[#allocation6 + $0xe8] sm:$0xf0] }
  0x39   :  { %473 = vmatpush.bf16.msrb.mxu0 %v1304_v20  ;;  %240 = vmatmul.bf16.vlgmr.msra.gmra.mxu1 %v116_v29  ;;  %v1492_v20 = vor.u32 %v1768_v18, %v1491_v17  ;;  %v1427_v27 = vld [vmem:[#allocation6 + $0x70] sm:$0xf]  ;;  %v1752_v29 = vld [vmem:[#allocation6 + $0x74] sm:$0xf0]  ;;  %v1751_v30 = vld [vmem:[#allocation6 + $0x74] sm:$0xf] }
  0x3a   :  { %486 = vmatpush.bf16.msrb.mxu1 %v1368_v23  ;;  %466 = vmatpush.bf16.msra.mxu3 %v1316_v0  ;;  %v1766_v23 = vld [vmem:[#allocation6 + $0xe4] sm:$0xf0]  ;;  %v1428_v33 = vor.u32 %v1752_v29, %v1427_v27  ;;  %v1475_v35 = vld [vmem:[#allocation6 + $0xd0] sm:$0xf]  ;;  %v1764_v36 = vld [vmem:[#allocation6 + $0xd4] sm:$0xf0] }
  0x3b   :  { %454 = vmatpush.bf16.msra.mxu2 %v1244_v8  ;;  %v1484_v28 = vor.u32 %v1766_v23, %v1483_v22  ;;  %v1419_v39 = vld [vmem:[#allocation6 + $0x60] sm:$0xf]  ;;  %v1750_v40 = vld [vmem:[#allocation6 + $0x64] sm:$0xf0]  ;;  %v1749_v42 = vld [vmem:[#allocation6 + $0x64] sm:$0xf] }
  0x3c   :  { %v1420_v41 = vor.u32 %v1750_v40, %v1419_v39  ;;  %v1467_v46 = vld [vmem:[#allocation6 + $0xc0] sm:$0xf]  ;;  %v1762_v47 = vld [vmem:[#allocation6 + $0xc4] sm:$0xf0]  ;;  %v1747_v51 = vld [vmem:[#allocation6 + $0x54] sm:$0xf] }
  0x3d   :  { %474 = vmatpush.bf16.msrb.mxu0 %v1296_v31  ;;  %v1429_v31 = vld [vmem:[#allocation6 + $0x78] sm:$0xf0]  ;;  %v1761_v52 = vld [vmem:[#allocation6 + $0xc4] sm:$0xf]  ;;  %v1469_v53 = vld [vmem:[#allocation6 + $0xc8] sm:$0xf0]  ;;  %v1468_v58 = vor.u32 %v1762_v47, %v1467_v46 }
  0x3e   :  { %487 = vmatpush.bf16.msrb.mxu1 %v1360_v32  ;;  %467 = vmatpush.bf16.msra.mxu3 %v1308_v12  ;;  %v1488_v32 = vor.u32 %v1765_v25, %v1485_v26  ;;  %v1432_v34 = vor.u32 %v1751_v30, %v1429_v31  ;;  %v1413_v54 = vld [vmem:[#allocation6 + $0x58] sm:$0xf0]  ;;  %v1403_v57 = vld [vmem:[#allocation6 + $0x40] sm:$0xf]  ;;  %v1746_v59 = vld [vmem:[#allocation6 + $0x44] sm:$0xf0]  ;;  %v1472_v62 = vor.u32 %v1761_v52, %v1469_v53 }
  0x3f   :  { %701 = vmatpush.bf16.msrb.mxu2 %v1428_v33  ;;  %v1745_v60 = vld [vmem:[#allocation6 + $0x44] sm:$0xf]  ;;  %v1405_v61 = vld [vmem:[#allocation6 + $0x48] sm:$0xf0]  ;;  %v1459_v63 = vld [vmem:[#allocation6 + $0xb0] sm:$0xf]  ;;  %v1404_v3 = vor.u32 %v1746_v59, %v1403_v57 }
  0x40   :  { %v1760_v0 = vld [vmem:[#allocation6 + $0xb4] sm:$0xf0]  ;;  %v1461_v2 = vld [vmem:[#allocation6 + $0xb8] sm:$0xf0]  ;;  %v1451_v7 = vld [vmem:[#allocation6 + $0xa0] sm:$0xf] }
  0x41   :  { %475 = vmatpush.bf16.msrb.mxu0 %v1288_v37  ;;  %v1763_v37 = vld [vmem:[#allocation6 + $0xd4] sm:$0xf]  ;;  %v1460_v5 = vor.u32 %v1760_v0, %v1459_v63  ;;  %v1758_v8 = vld [vmem:[#allocation6 + $0xa4] sm:$0xf0]  ;;  %v133_v9 = vld [vmem:[%s2060_s2] sm:$0x3] }
  0x42   :  { %488 = vmatpush.bf16.msrb.mxu1 %v1352_v38  ;;  %714 = vmatpush.bf16.msrb.mxu3 %v1492_v20  ;;  %v1477_v38 = vld [vmem:[#allocation6 + $0xd8] sm:$0xf0]  ;;  %v1757_v10 = vld [vmem:[#allocation6 + $0xa4] sm:$0xf]  ;;  %v1453_v11 = vld [vmem:[#allocation6 + $0xa8] sm:$0xf0]  ;;  %v1452_v12 = vor.u32 %v1758_v8, %v1451_v7 }
  0x43   :  { %v1480_v48 = vor.u32 %v1763_v37, %v1477_v38  ;;  %702 = vmatpush.bf16.msrb.mxu2 %v1420_v41  ;;  %v1456_v14 = vor.u32 %v1757_v10, %v1453_v11  ;;  %v136_v15 = vperm.slane %v133_v9, 1  ;;  %v1395_v26 = vld [vmem:[#allocation6 + $0x30] sm:$0xf]  ;;  %v1744_v27 = vld [vmem:[#allocation6 + $0x34] sm:$0xf0] }
  0x44   :  { %v1396_v29 = vor.u32 %v1744_v27, %v1395_v26  ;;  %v1397_v30 = vld [vmem:[#allocation6 + $0x38] sm:$0xf0]  ;;  %v1756_v33 = vld [vmem:[#allocation6 + $0x94] sm:$0xf0]  ;;  %v1387_v38 = vld [vmem:[#allocation6 + $0x20] sm:$0xf] }
  0x45   :  { %476 = vmatpush.bf16.msrb.mxu0 %v1280_v43  ;;  %v1421_v43 = vld [vmem:[#allocation6 + $0x68] sm:$0xf0]  ;;  %v1742_v39 = vld [vmem:[#allocation6 + $0x24] sm:$0xf0]  ;;  %v1741_v40 = vld [vmem:[#allocation6 + $0x24] sm:$0xf] }
  0x46   :  { %489 = vmatpush.bf16.msrb.mxu1 %v1344_v44  ;;  %715 = vmatpush.bf16.msrb.mxu3 %v1484_v28  ;;  %v1476_v44 = vor.u32 %v1764_v36, %v1475_v35  ;;  %v1424_v45 = vor.u32 %v1749_v42, %v1421_v43  ;;  %v1743_v28 = vld [vmem:[#allocation6 + $0x34] sm:$0xf]  ;;  %v1445_v36 = vld [vmem:[#allocation6 + $0x98] sm:$0xf0]  ;;  %v1388_v41 = vor.u32 %v1742_v39, %v1387_v38  ;;  %v1389_v42 = vld [vmem:[#allocation6 + $0x28] sm:$0xf0] }
  0x47   :  { %v1400_v31 = vor.u32 %v1743_v28, %v1397_v30  ;;  %v1392_v43 = vor.u32 %v1741_v40, %v1389_v42  ;;  %v1753_v46 = vld [vmem:[#allocation6 + $0x84] sm:$0xf]  ;;  %v1739_v53 = vld [vmem:[#allocation6 + $0x14] sm:$0xf]  ;;  %v1738_v57 = vld [vmem:[#allocation6 + $0x4] sm:$0xf0] }
  0x48   :  { %v1800_v63 = vld [vmem:[#allocation7 + $0xf4] sm:$0xf0]  ;;  %v1799_v0 = vld [vmem:[#allocation7 + $0xf4] sm:$0xf]  ;;  %v1613_v7 = vld [vmem:[#allocation7 + $0xe8] sm:$0xf0] }
  0x49   :  { %477 = vmatpush.bf16.msrb.mxu0 %v1272_v49  ;;  %v1411_v49 = vld [vmem:[#allocation6 + $0x50] sm:$0xf]  ;;  %v1784_v10 = vld [vmem:[#allocation7 + $0x74] sm:$0xf0]  ;;  %v1783_v11 = vld [vmem:[#allocation7 + $0x74] sm:$0xf] }
  0x4a   :  { %490 = vmatpush.bf16.msrb.mxu1 %v1336_v50  ;;  %v1748_v50 = vld [vmem:[#allocation6 + $0x54] sm:$0xf0]  ;;  %716 = vmatpush.bf16.msrb.mxu3 %v1476_v44  ;;  %v1435_v44 = vld [vmem:[#allocation6 + $0x80] sm:$0xf]  ;;  %v1555_v8 = vld [vmem:[#allocation7 + $0x70] sm:$0xf] }
  0x4b   :  { %v1595_v27 = vld [vmem:[#allocation7 + $0xc0] sm:$0xf]  ;;  %v1794_v28 = vld [vmem:[#allocation7 + $0xc4] sm:$0xf0]  ;;  %v1539_v30 = vld [vmem:[#allocation7 + $0x50] sm:$0xf] }
  0x4c   :  { %v281_v38 = vld [vmem:[%s2062_s4] sm:$0x3]  ;;  %v1596_v39 = vor.u32 %v1794_v28, %v1595_v27  ;;  %v1773_v27 = vld [vmem:[#allocation7 + $0x24] sm:$0xf] }
  0x4d   :  { %478 = vmatpush.bf16.msrb.mxu0 %v1264_v55  ;;  %v1412_v55 = vor.u32 %v1748_v50, %v1411_v49  ;;  %v1379_v50 = vld [vmem:[#allocation6 + $0x10] sm:$0xf] }
  0x4e   :  { %491 = vmatpush.bf16.msrb.mxu1 %v1328_v56  ;;  %v1416_v56 = vor.u32 %v1747_v51, %v1413_v54  ;;  %717 = vmatpush.bf16.msrb.mxu3 %v1468_v58  ;;  %v1740_v51 = vld [vmem:[#allocation6 + $0x14] sm:$0xf0]  ;;  %v1381_v54 = vld [vmem:[#allocation6 + $0x18] sm:$0xf0]  ;;  %v1737_v58 = vld [vmem:[#allocation6 + $0x4] sm:$0xf] }
  0x4f   :  { %703 = vmatpush.bf16.msrb.mxu2 %v1412_v55  ;;  %v1380_v52 = vor.u32 %v1740_v51, %v1379_v50  ;;  %v1384_v55 = vor.u32 %v1739_v53, %v1381_v54 }
  0x51   :  { %479 = vmatpush.bf16.msrb.mxu0 %v1256_v1  ;;  %v1759_v1 = vld [vmem:[#allocation6 + $0xb4] sm:$0xf] }
  0x52   :  { %492 = vmatpush.bf16.msrb.mxu1 %v1320_v4  ;;  %v1408_v4 = vor.u32 %v1745_v60, %v1405_v61  ;;  %v1464_v6 = vor.u32 %v1759_v1, %v1461_v2  ;;  %718 = vmatpush.bf16.msrb.mxu3 %v1460_v5  ;;  %v1373_v60 = vld [vmem:[#allocation6 + $0x8] sm:$0xf0]  ;;  %v1621_v2 = vld [vmem:[#allocation7 + $0xf8] sm:$0xf0] }
  0x53   :  { %704 = vmatpush.bf16.msrb.mxu2 %v1404_v3  ;;  %v1376_v61 = vor.u32 %v1737_v58, %v1373_v60  ;;  %v1611_v3 = vld [vmem:[#allocation7 + $0xe0] sm:$0xf]  ;;  %v1624_v5 = vor.u32 %v1799_v0, %v1621_v2  ;;  %v1792_v60 = vld [vmem:[#allocation7 + $0xb4] sm:$0xf0]  ;;  %v1778_v2 = vld [vmem:[#allocation7 + $0x44] sm:$0xf0] }
  0x55   :  { %480 = vmatpush.bf16.msrb.mxu0 %v1248_v13  ;;  %v135_v13 = vperm.slane %v133_v9, 0 }
  0x56   :  { %493 = vmatpush.bf16.msrb.mxu1 %v1312_v16  ;;  %719 = vmatpush.bf16.msrb.mxu3 %v1452_v12  ;;  %v1557_v12 = vld [vmem:[#allocation7 + $0x78] sm:$0xf0] }
  0x57   :  { %705 = vmatpush.bf16.msrb.mxu2 %v1396_v29 }
  0x59   :  { %727 = vmatpush.bf16.msra.mxu0 %v1432_v34  ;;  %v1755_v34 = vld [vmem:[#allocation6 + $0x94] sm:$0xf] }
  0x5a   :  { %740 = vmatpush.bf16.msra.mxu1 %v1496_v24  ;;  %v1448_v37 = vor.u32 %v1755_v34, %v1445_v36  ;;  %v1597_v34 = vld [vmem:[#allocation7 + $0xc8] sm:$0xf0] }
  0x5b   :  { %706 = vmatpush.bf16.msrb.mxu2 %v1388_v41  ;;  %v284_v41 = vperm.slane %v281_v38, 1 }
  0x5d   :  { %728 = vmatpush.bf16.msra.mxu0 %v1424_v45  ;;  %v1754_v45 = vld [vmem:[#allocation6 + $0x84] sm:$0xf0] }
  0x5e   :  { %741 = vmatpush.bf16.msra.mxu1 %v1488_v32  ;;  %v1443_v32 = vld [vmem:[#allocation6 + $0x90] sm:$0xf]  ;;  %v1436_v47 = vor.u32 %v1754_v45, %v1435_v44 }
  0x5f   :  { %v1444_v35 = vor.u32 %v1756_v33, %v1443_v32  ;;  %707 = vmatpush.bf16.msrb.mxu2 %v1380_v52  ;;  %v1779_v32 = vld [vmem:[#allocation7 + $0x54] sm:$0xf]  ;;  %v1793_v33 = vld [vmem:[#allocation7 + $0xc4] sm:$0xf] }
  0x60   :  { %v1600_v40 = vor.u32 %v1793_v33, %v1597_v34  ;;  %v1785_v33 = vld [vmem:[#allocation7 + $0x84] sm:$0xf] }
  0x61   :  { %729 = vmatpush.bf16.msra.mxu0 %v1416_v56  ;;  %720 = vmatpush.bf16.msrb.mxu3 %v1444_v35  ;;  %v1371_v56 = vld [vmem:[#allocation6] sm:$0xf]  ;;  %v1541_v35 = vld [vmem:[#allocation7 + $0x58] sm:$0xf0] }
  0x62   :  { %742 = vmatpush.bf16.msra.mxu1 %v1480_v48  ;;  %v1437_v48 = vld [vmem:[#allocation6 + $0x88] sm:$0xf0]  ;;  %v1372_v59 = vor.u32 %v1738_v57, %v1371_v56 }
  0x63   :  { %v1440_v49 = vor.u32 %v1753_v46, %v1437_v48  ;;  %v283_v46 = vperm.slane %v281_v38, 0  ;;  %v1772_v38 = vld [vmem:[#allocation7 + $0x14] sm:$0xf0] }
  0x64   :  { %708 = vmatpush.bf16.msrb.mxu2 %v1372_v59  ;;  %v1587_v59 = vld [vmem:[#allocation7 + $0xb0] sm:$0xf] }
  0x65   :  { %730 = vmatpush.bf16.msra.mxu0 %v1408_v4  ;;  %721 = vmatpush.bf16.msrb.mxu3 %v1436_v47  ;;  %v1798_v4 = vld [vmem:[#allocation7 + $0xe4] sm:$0xf0] }
  0x66   :  { %743 = vmatpush.bf16.msra.mxu1 %v1472_v62  ;;  %v1619_v62 = vld [vmem:[#allocation7 + $0xf0] sm:$0xf]  ;;  %v1612_v9 = vor.u32 %v1798_v4, %v1611_v3  ;;  %v1777_v3 = vld [vmem:[#allocation7 + $0x44] sm:$0xf] }
  0x67   :  { %v1620_v1 = vor.u32 %v1800_v63, %v1619_v62  ;;  %v1588_v62 = vor.u32 %v1792_v60, %v1587_v59  ;;  %v1589_v63 = vld [vmem:[#allocation7 + $0xb8] sm:$0xf0] }
  0x69   :  { %731 = vmatpush.bf16.msra.mxu0 %v1400_v31  ;;  %v1780_v31 = vld [vmem:[#allocation7 + $0x54] sm:$0xf0] }
  0x6a   :  { %744 = vmatpush.bf16.msra.mxu1 %v1464_v6  ;;  %v1797_v6 = vld [vmem:[#allocation7 + $0xe4] sm:$0xf]  ;;  %v1540_v36 = vor.u32 %v1780_v31, %v1539_v30  ;;  %v1563_v31 = vld [vmem:[#allocation7 + $0x80] sm:$0xf] }
  0x6d   :  { %732 = vmatpush.bf16.msra.mxu0 %v1392_v43 }
  0x6e   :  { %745 = vmatpush.bf16.msra.mxu1 %v1456_v14  ;;  %v1556_v14 = vor.u32 %v1784_v10, %v1555_v8  ;;  %v1789_v10 = vld [vmem:[#allocation7 + $0xa4] sm:$0xf] }
  0x71   :  { %733 = vmatpush.bf16.msra.mxu0 %v1384_v55 }
  0x72   :  { %746 = vmatpush.bf16.msra.mxu1 %v1448_v37  ;;  %v1544_v37 = vor.u32 %v1779_v32, %v1541_v35  ;;  %v1786_v32 = vld [vmem:[#allocation7 + $0x84] sm:$0xf0]  ;;  %v1565_v35 = vld [vmem:[#allocation7 + $0x88] sm:$0xf0] }
  0x73   :  { %v1564_v34 = vor.u32 %v1786_v32, %v1563_v31 }
  0x75   :  { %734 = vmatpush.bf16.msra.mxu0 %v1376_v61  ;;  %v1791_v61 = vld [vmem:[#allocation7 + $0xb4] sm:$0xf] }
  0x76   :  { %747 = vmatpush.bf16.msra.mxu1 %v1440_v49  ;;  %v1592_v0 = vor.u32 %v1791_v61, %v1589_v63 }
  0xb5   :  { %v228_v16 = vpop.f32.mrf.mxu0 }
  0xb6   :  { %v229_v17 = vadd.f32 %v228_v16, %v135_v13  ;;  %v241_v18 = vpop.f32.mrf.mxu1  ;;  %v1616_v13 = vor.u32 %v1797_v6, %v1613_v7  ;;  %v1603_v16 = vld [vmem:[#allocation7 + $0xd0] sm:$0xf]  ;;  %v1579_v6 = vld [vmem:[#allocation7 + $0xa0] sm:$0xf]  ;;  %v1790_v7 = vld [vmem:[#allocation7 + $0xa4] sm:$0xf0] }
  0xb7   :  { %v242_v19 = vadd.f32 %v241_v18, %v136_v15  ;;  %v1560_v15 = vor.u32 %v1783_v11, %v1557_v12  ;;  %v1795_v18 = vld [vmem:[#allocation7 + $0xd4] sm:$0xf]  ;;  %v1581_v11 = vld [vmem:[#allocation7 + $0xa8] sm:$0xf0] }
  0xb8   :  { %v245_v20 = vmax.f32 %v229_v17, 0.0  ;;  %v1796_v17 = vld [vmem:[#allocation7 + $0xd4] sm:$0xf0]  ;;  %v1584_v12 = vor.u32 %v1789_v10, %v1581_v11 }
  0xb9   :  { %v246_v21 = vmax.f32 %v242_v19, 0.0  ;;  %v1605_v19 = vld [vmem:[#allocation7 + $0xd8] sm:$0xf0] }
  0xba   :  { %v247_v22 = vpack.c.bf16 %v245_v20, %v245_v20  ;;  %v1547_v20 = vld [vmem:[#allocation7 + $0x60] sm:$0xf]  ;;  %v1608_v29 = vor.u32 %v1795_v18, %v1605_v19  ;;  %v1571_v19 = vld [vmem:[#allocation7 + $0x90] sm:$0xf]  ;;  %v1812_v11 = vld [vmem:[#allocation9 + $0x58] sm:$0xff] }
  0xbb   :  { %v248_v23 = vpack.c.bf16 %v246_v21, %v246_v21  ;;  %v1782_v21 = vld [vmem:[#allocation7 + $0x64] sm:$0xf0] }
  0xbc   :  { %455 = vmatmul.bf16.vlgmr.msra.gmra.mxu2 %v247_v22  ;;  %481 = vmatmul.bf16.vlgmr.msrb.gmra.mxu0 %v247_v22  ;;  %v1548_v22 = vor.u32 %v1782_v21, %v1547_v20  ;;  %v1788_v20 = vld [vmem:[#allocation7 + $0x94] sm:$0xf0] }
  0xbd   :  { %468 = vmatmul.bf16.vlgmr.msra.gmra.mxu3 %v248_v23  ;;  %494 = vmatmul.bf16.vlgmr.msrb.gmra.mxu1 %v248_v23  ;;  %v230_v24 = vpop.f32.mrf.mxu0  ;;  %v1781_v23 = vld [vmem:[#allocation7 + $0x64] sm:$0xf]  ;;  %v1572_v21 = vor.u32 %v1788_v20, %v1571_v19 }
  0xbe   :  { %v243_v25 = vpop.f32.mrf.mxu1  ;;  %968 = vmatpush.bf16.msra.mxu3 %v1620_v1  ;;  %994 = vmatpush.bf16.msrb.mxu1 %v1624_v5  ;;  %v1549_v24 = vld [vmem:[#allocation7 + $0x68] sm:$0xf0]  ;;  %v1531_v1 = vld [vmem:[#allocation7 + $0x40] sm:$0xf] }
  0xbf   :  { %955 = vmatpush.bf16.msra.mxu2 %v1556_v14  ;;  %981 = vmatpush.bf16.msrb.mxu0 %v1560_v15  ;;  %v1604_v25 = vor.u32 %v1796_v17, %v1603_v16  ;;  %v1552_v26 = vor.u32 %v1781_v23, %v1549_v24  ;;  %v1532_v4 = vor.u32 %v1778_v2, %v1531_v1  ;;  %v1533_v5 = vld [vmem:[#allocation7 + $0x48] sm:$0xf0]  ;;  %v1776_v14 = vld [vmem:[#allocation7 + $0x34] sm:$0xf0]  ;;  %v1775_v15 = vld [vmem:[#allocation7 + $0x34] sm:$0xf] }
  0xc0   :  { %v1536_v8 = vor.u32 %v1777_v3, %v1533_v5  ;;  %v1525_v17 = vld [vmem:[#allocation7 + $0x38] sm:$0xf0]  ;;  %v1801_v19 = vld [vmem:[#allocation9] sm:$0xff] }
  0xc1   :  { %v1528_v18 = vor.u32 %v1775_v15, %v1525_v17  ;;  %v1573_v23 = vld [vmem:[#allocation7 + $0x98] sm:$0xf0]  ;;  %v1810_v15 = vld [vmem:[#allocation9 + $0x48] sm:$0xff]  ;;  %v1809_v17 = vld [vmem:[#allocation9 + $0x40] sm:$0xff] }
  0xc2   :  { %969 = vmatpush.bf16.msra.mxu3 %v1612_v9  ;;  %995 = vmatpush.bf16.msrb.mxu1 %v1616_v13  ;;  %v1580_v9 = vor.u32 %v1790_v7, %v1579_v6  ;;  %v1523_v13 = vld [vmem:[#allocation7 + $0x30] sm:$0xf] }
  0xc3   :  { %956 = vmatpush.bf16.msra.mxu2 %v1548_v22  ;;  %982 = vmatpush.bf16.msrb.mxu0 %v1552_v26  ;;  %v1524_v16 = vor.u32 %v1776_v14, %v1523_v13  ;;  %v1787_v22 = vld [vmem:[#allocation7 + $0x94] sm:$0xf]  ;;  %v1774_v26 = vld [vmem:[#allocation7 + $0x24] sm:$0xf0]  ;;  %v1804_v14 = vld [vmem:[#allocation9 + $0x18] sm:$0xff] }
  0xc4   :  { %v1576_v24 = vor.u32 %v1787_v22, %v1573_v23  ;;  %v1811_v13 = vld [vmem:[#allocation9 + $0x50] sm:$0xff] }
  0xc6   :  { %970 = vmatpush.bf16.msra.mxu3 %v1604_v25  ;;  %996 = vmatpush.bf16.msrb.mxu1 %v1608_v29  ;;  %v1515_v25 = vld [vmem:[#allocation7 + $0x20] sm:$0xf]  ;;  %v1517_v29 = vld [vmem:[#allocation7 + $0x28] sm:$0xf0] }
  0xc7   :  { %957 = vmatpush.bf16.msra.mxu2 %v1540_v36  ;;  %983 = vmatpush.bf16.msrb.mxu0 %v1544_v37  ;;  %v1516_v28 = vor.u32 %v1774_v26, %v1515_v25  ;;  %v1520_v30 = vor.u32 %v1773_v27, %v1517_v29  ;;  %v1568_v36 = vor.u32 %v1785_v33, %v1565_v35  ;;  %v1507_v37 = vld [vmem:[#allocation7 + $0x10] sm:$0xf] }
  0xca   :  { %971 = vmatpush.bf16.msra.mxu3 %v1596_v39  ;;  %997 = vmatpush.bf16.msrb.mxu1 %v1600_v40  ;;  %v1508_v39 = vor.u32 %v1772_v38, %v1507_v37  ;;  %v1771_v40 = vld [vmem:[#allocation7 + $0x14] sm:$0xf] }
  0xcb   :  { %958 = vmatpush.bf16.msra.mxu2 %v1532_v4  ;;  %984 = vmatpush.bf16.msrb.mxu0 %v1536_v8 }
  0xce   :  { %972 = vmatpush.bf16.msra.mxu3 %v1588_v62  ;;  %998 = vmatpush.bf16.msrb.mxu1 %v1592_v0 }
  0xcf   :  { %959 = vmatpush.bf16.msra.mxu2 %v1524_v16  ;;  %985 = vmatpush.bf16.msrb.mxu0 %v1528_v18  ;;  %v1803_v16 = vld [vmem:[#allocation9 + $0x10] sm:$0xff]  ;;  %v1802_v18 = vld [vmem:[#allocation9 + $0x8] sm:$0xff] }
  0xd2   :  { %973 = vmatpush.bf16.msra.mxu3 %v1580_v9  ;;  %999 = vmatpush.bf16.msrb.mxu1 %v1584_v12  ;;  %v1805_v12 = vld [vmem:[#allocation9 + $0x20] sm:$0xff] }
  0xd3   :  { %960 = vmatpush.bf16.msra.mxu2 %v1516_v28  ;;  %986 = vmatpush.bf16.msrb.mxu0 %v1520_v30 }
  0xd6   :  { %974 = vmatpush.bf16.msra.mxu3 %v1572_v21  ;;  %1000 = vmatpush.bf16.msrb.mxu1 %v1576_v24  ;;  %v789_v21 = vld [vmem:[%s2066_s8] sm:$0x3] }
  0xd7   :  { %961 = vmatpush.bf16.msra.mxu2 %v1508_v39  ;;  %v792_v22 = vperm.slane %v789_v21, 1  ;;  %v791_v28 = vperm.slane %v789_v21, 0 }
  0xda   :  { %975 = vmatpush.bf16.msra.mxu3 %v1564_v34  ;;  %1001 = vmatpush.bf16.msrb.mxu1 %v1568_v36 }
 0x139   :  { %v482_v42 = vpop.f32.mrf.mxu0 }
 0x13a   :  { %v483_v43 = vadd.f32 %v482_v42, %v284_v41  ;;  %v495_v44 = vpop.f32.mrf.mxu1  ;;  %v1509_v41 = vld [vmem:[#allocation7 + $0x18] sm:$0xf0] }
 0x13b   :  { %v1512_v42 = vor.u32 %v1771_v40, %v1509_v41  ;;  %v1826_v40 = vld [vmem:[%s2068_s10] ss:$0 sm:$0xff] }
 0x13c   :  { %v496_v45 = vadd.f32 %v495_v44, %v483_v43  ;;  %v1499_v43 = vld [vmem:[#allocation7] sm:$0xf]  ;;  %v1770_v44 = vld [vmem:[#allocation7 + $0x4] sm:$0xf0] }
 0x13d   :  { %987 = vmatpush.bf16.msrb.mxu0 %v1512_v42 }
 0x13e   :  { %v500_v47 = vmax.f32 %v496_v45, 0.0  ;;  %v1769_v45 = vld [vmem:[#allocation7 + $0x4] sm:$0xf] }
 0x13f   :  { %v456_v48 = vpop.f32.mrf.mxu2 }
 0x140   :  { %v502_v49 = vpack.c.bf16 %v500_v47, %v500_v47  ;;  %v457_v50 = vadd.f32 %v456_v48, %v283_v46  ;;  %v469_v51 = vpop.f32.mrf.mxu3  ;;  %v1500_v46 = vor.u32 %v1770_v44, %v1499_v43  ;;  %v1501_v47 = vld [vmem:[#allocation7 + $0x8] sm:$0xf0] }
 0x141   :  { %v484_v52 = vpop.f32.mrf.mxu0  ;;  %v1504_v48 = vor.u32 %v1769_v45, %v1501_v47 }
 0x142   :  { %v470_v53 = vadd.f32 %v469_v51, %v457_v50  ;;  %v497_v54 = vpop.f32.mrf.mxu1  ;;  %722 = vmatmul.bf16.vlgmr.msrb.gmra.mxu3 %v502_v49  ;;  %748 = vmatmul.bf16.vlgmr.msra.gmra.mxu1 %v502_v49  ;;  %v1816_v49 = vld [vmem:[#allocation9 + $0x78] sm:$0xff]  ;;  %v1815_v51 = vld [vmem:[#allocation9 + $0x70] sm:$0xff] }
 0x143   :  { %962 = vmatpush.bf16.msra.mxu2 %v1500_v46  ;;  %988 = vmatpush.bf16.msrb.mxu0 %v1504_v48  ;;  %v1808_v50 = vld [vmem:[#allocation9 + $0x38] sm:$0xff]  ;;  %v1807_v52 = vld [vmem:[#allocation9 + $0x30] sm:$0xff]  ;;  %v1806_v54 = vld [vmem:[#allocation9 + $0x28] sm:$0xff] }
 0x144   :  { %v499_v55 = vmax.f32 %v470_v53, 0.0  ;;  %1156 = vmatpush.bf16.msrb.mxu3 %v1816_v49  ;;  %v1814_v53 = vld [vmem:[#allocation9 + $0x68] sm:$0xff] }
 0x146   :  { %v501_v56 = vpack.c.bf16 %v499_v55, %v499_v55  ;;  %v1813_v55 = vld [vmem:[#allocation9 + $0x60] sm:$0xff] }
 0x147   :  { %v458_v57 = vpop.f32.mrf.mxu2 }
 0x148   :  { %v471_v58 = vpop.f32.mrf.mxu3  ;;  %709 = vmatmul.bf16.vlgmr.msrb.gmra.mxu2 %v501_v56  ;;  %735 = vmatmul.bf16.vlgmr.msra.gmra.mxu0 %v501_v56  ;;  %v535_v57 = vld [vmem:[%s2064_s6] sm:$0x3] }
 0x149   :  { %1143 = vmatpush.bf16.msrb.mxu2 %v1808_v50  ;;  %1157 = vmatpush.bf16.msrb.mxu3 %v1815_v51  ;;  %v538_v58 = vperm.slane %v535_v57, 1  ;;  %v537_v0 = vperm.slane %v535_v57, 0 }
 0x14d   :  { %1144 = vmatpush.bf16.msrb.mxu2 %v1807_v52  ;;  %1158 = vmatpush.bf16.msrb.mxu3 %v1814_v53 }
 0x151   :  { %1145 = vmatpush.bf16.msrb.mxu2 %v1806_v54  ;;  %1159 = vmatpush.bf16.msrb.mxu3 %v1813_v55 }
 0x155   :  { %1160 = vmatpush.bf16.msrb.mxu3 %v1812_v11  ;;  %1146 = vmatpush.bf16.msrb.mxu2 %v1805_v12 }
 0x159   :  { %1161 = vmatpush.bf16.msrb.mxu3 %v1811_v13  ;;  %1147 = vmatpush.bf16.msrb.mxu2 %v1804_v14 }
 0x15d   :  { %1162 = vmatpush.bf16.msrb.mxu3 %v1810_v15  ;;  %1148 = vmatpush.bf16.msrb.mxu2 %v1803_v16 }
 0x161   :  { %1163 = vmatpush.bf16.msrb.mxu3 %v1809_v17  ;;  %1149 = vmatpush.bf16.msrb.mxu2 %v1802_v18 }
 0x165   :  { %1150 = vmatpush.bf16.msrb.mxu2 %v1801_v19 }
 0x1bf   :  { %v749_v56 = vpop.f32.mrf.mxu1 }
 0x1c5   :  { %v723_v59 = vpop.f32.mrf.mxu3  ;;  %v736_v60 = vpop.f32.mrf.mxu0 }
 0x1c6   :  { %v737_v61 = vadd.f32 %v736_v60, %v538_v58 }
 0x1c7   :  { %v751_v62 = vpop.f32.mrf.mxu1 }
 0x1c8   :  { %v750_v63 = vadd.f32 %v749_v56, %v737_v61 }
 0x1ca   :  { %v754_v1 = vmax.f32 %v750_v63, 0.0 }
 0x1cb   :  { %v710_v2 = vpop.f32.mrf.mxu2 }
 0x1cc   :  { %v756_v3 = vpack.c.bf16 %v754_v1, %v754_v1  ;;  %v711_v4 = vadd.f32 %v710_v2, %v537_v0 }
 0x1cd   :  { %v725_v5 = vpop.f32.mrf.mxu3  ;;  %v738_v6 = vpop.f32.mrf.mxu0 }
 0x1ce   :  { %v724_v7 = vadd.f32 %v723_v59, %v711_v4  ;;  %976 = vmatmul.bf16.vlgmr.msra.gmra.mxu3 %v756_v3  ;;  %1002 = vmatmul.bf16.vlgmr.msrb.gmra.mxu1 %v756_v3 }
 0x1d0   :  { %v753_v8 = vmax.f32 %v724_v7, 0.0 }
 0x1d2   :  { %v755_v9 = vpack.c.bf16 %v753_v8, %v753_v8 }
 0x1d3   :  { %v712_v10 = vpop.f32.mrf.mxu2 }
 0x1d4   :  { %963 = vmatmul.bf16.vlgmr.msra.gmra.mxu2 %v755_v9  ;;  %989 = vmatmul.bf16.vlgmr.msrb.gmra.mxu0 %v755_v9 }
 0x24b   :  { %v1003_v20 = vpop.f32.mrf.mxu1 }
 0x251   :  { %v977_v23 = vpop.f32.mrf.mxu3  ;;  %v990_v24 = vpop.f32.mrf.mxu0 }
 0x252   :  { %v991_v25 = vadd.f32 %v990_v24, %v792_v22 }
 0x253   :  { %v1005_v26 = vpop.f32.mrf.mxu1 }
 0x254   :  { %v1004_v27 = vadd.f32 %v1003_v20, %v991_v25 }
 0x256   :  { %v1008_v29 = vmax.f32 %v1004_v27, 0.0 }
 0x257   :  { %v964_v30 = vpop.f32.mrf.mxu2 }
 0x258   :  { %v1010_v31 = vpack.c.bf16 %v1008_v29, %v1008_v29  ;;  %v965_v32 = vadd.f32 %v964_v30, %v791_v28 }
 0x259   :  { %v979_v33 = vpop.f32.mrf.mxu3  ;;  %v992_v34 = vpop.f32.mrf.mxu0 }
 0x25a   :  { %v978_v35 = vadd.f32 %v977_v23, %v965_v32  ;;  %1164 = vmatmul.bf16.vlgmr.msrb.gmra.mxu3 %v1010_v31 }
 0x25c   :  { %v1007_v36 = vmax.f32 %v978_v35, 0.0 }
 0x25e   :  { %v1009_v37 = vpack.c.bf16 %v1007_v36, %v1007_v36 }
 0x25f   :  { %v966_v38 = vpop.f32.mrf.mxu2 }
 0x260   :  { %1151 = vmatmul.bf16.vlgmr.msrb.gmra.mxu2 %v1009_v37 }
 0x2dd   :  { %v1165_v39 = vpop.f32.mrf.mxu3 }
 0x2e3   :  { %v1152_v41 = vpop.f32.mrf.mxu2 }
 0x2e4   :  { %v1153_v42 = vadd.f32 %v1826_v40, %v1152_v41 }
 0x2e5   :  { %v1167_v43 = vpop.f32.mrf.mxu3 }
 0x2e6   :  { %v1166_v44 = vadd.f32 %v1165_v39, %v1153_v42 }
 0x2e8   :  { %1169 = vst [vmem:[%s2069_s11] sm:$0xff] %v1166_v44 }
 0x2eb   :  { %v1154_v45 = vpop.f32.mrf.mxu2 }
 0x2ec   :  { %1174 = vsyncpa [#allocation3], 1 }
 0x2ed   :  { %1175 = vsyncpa [#allocation5], 1 }
 0x2ee   :  { %1176 = vsyncpa [#allocation8], 1 }

</bundles_post_ra>
